<compile_context>
chip_gen: v6e
topology: v6e:2x2x1
jax: 0.10.0
libtpu: 0.0.40
codegen_flags: <defaults>
</compile_context>

<pallas_src>
import jax
import jax.numpy as jnp
from jax.experimental import pallas as pl
from jax.experimental.pallas import tpu as pltpu


def _mish_kernel(x_ref, o_ref):
    x = x_ref[...].astype(jnp.float32)
    # mish(x) = x * tanh(softplus(x)) = x * n / (n + 2), n = e*(e+2), e = exp(x)
    # (algebraically exact; no cancellation since n, n+2 > 0).
    # Clamp the exp argument: tanh(softplus(20)) == 1 in f32 and e(20)^2 ~ 2.4e17
    # stays far from f32 overflow.
    e = jnp.exp(jnp.minimum(x, 20.0))
    n = e * (e + 2.0)
    o_ref[...] = (x * n / (n + 2.0)).astype(o_ref.dtype)


def mish(x: jax.Array, *, tile_rows: int = 4096) -> jax.Array:
    """Elementwise Mish. Accepts any shape (e.g. NCHW); returns same shape/dtype."""
    orig_shape = x.shape
    orig_dtype = x.dtype
    total = x.size
    lanes = 128

    if total == 0:
        return x

    rows = pl.cdiv(total, lanes)

    # Sublane granularity by element width (f32: 8, bf16/f16: 16, 8-bit: 32).
    itemsize = x.dtype.itemsize
    sub = 8 if itemsize >= 4 else (16 if itemsize == 2 else 32)

    if rows <= tile_rows:
        if rows >= 2 * sub:
            # Split into >=2 grid steps so the "parallel" axis can use both TCs (v7x).
            tr = ((pl.cdiv(rows, 2) + sub - 1) // sub) * sub
        else:
            tr = rows  # single full-extent block
    else:
        tr = tile_rows

    grid = (pl.cdiv(rows, tr),)

    aligned = (total % lanes) == 0
    if aligned:
        # Contiguous reshape: metadata-only, no HBM copy.
        x2d = x.reshape(rows, lanes)
    else:
        # Slow path: pad only up to the next lane multiple (<= 127 elements).
        x2d = jnp.pad(jnp.ravel(x), (0, rows * lanes - total)).reshape(rows, lanes)

    cost = pl.CostEstimate(
        flops=6 * total,
        transcendentals=2 * total,
        bytes_accessed=2 * total * itemsize,
    )

    out2d = pl.pallas_call(
        _mish_kernel,
        out_shape=jax.ShapeDtypeStruct((rows, lanes), orig_dtype),
        grid_spec=pltpu.PrefetchScalarGridSpec(
            num_scalar_prefetch=0,
            grid=grid,
            in_specs=[pl.BlockSpec((tr, lanes), lambda i: (i, 0))],
            out_specs=pl.BlockSpec((tr, lanes), lambda i: (i, 0)),
        ),
        compiler_params=pltpu.CompilerParams(
            dimension_semantics=("parallel",),
        ),
        cost_estimate=cost,
    )(x2d)

    if aligned:
        return out2d.reshape(orig_shape)
    return out2d.reshape(-1)[:total].reshape(orig_shape)


def mish_ref(x):
    # Pure-JAX reference (matches torch: x * tanh(softplus(x)))
    return x * jnp.tanh(jax.nn.softplus(x.astype(jnp.float32))).astype(x.dtype)


if __name__ == "__main__":
    key = jax.random.PRNGKey(0)

    # NCHW input consistent with typical conv-net usage of Mish (lane-aligned fast path).
    x = jax.random.normal(key, (2, 4, 16, 16), dtype=jnp.float32) * 3.0
    y = mish(x)
    jax.block_until_ready(y)
    y_ref = mish_ref(x)
    assert y.shape == x.shape and y.dtype == x.dtype
    assert jnp.allclose(y, y_ref, atol=1e-5, rtol=1e-5), "mismatch vs reference (aligned)"

    # Non-128-aligned shape exercises the padded slow path.
    x2 = jax.random.normal(jax.random.PRNGKey(1), (3, 5, 7), dtype=jnp.float32) * 3.0
    y2 = mish(x2)
    jax.block_until_ready(y2)
    y2_ref = mish_ref(x2)
    assert y2.shape == x2.shape and y2.dtype == x2.dtype
    assert jnp.allclose(y2, y2_ref, atol=1e-5, rtol=1e-5), "mismatch vs reference (unaligned)"

    print("KERNEL_OK")
</pallas_src>

<mosaic_0001>
module attributes {stable_mosaic.version = 11 : i64} {
  func.func @_mish_kernel(%arg0: i32, %arg1: memref<8x128xf32, #tpu.memory_space<vmem>>, %arg2: memref<8x128xf32, #tpu.memory_space<vmem>>) attributes {dimension_semantics = [#tpu.dimension_semantics<parallel>], iteration_bounds = array<i64: 2>, scalar_prefetch = 0 : i64, scratch_operands = 0 : i64, tpu.core_type = #tpu.core_type<tc>, window_params = [{transform_indices = @transform_0, window_bounds = array<i64: 8, 128>}, {transform_indices = @transform_1, window_bounds = array<i64: 8, 128>}]} {
    %c0 = arith.constant 0 : index
    %c0_0 = arith.constant 0 : index
    %0 = vector.load %arg1[%c0, %c0_0] : memref<8x128xf32, #tpu.memory_space<vmem>>, vector<8x128xf32>
    %cst = arith.constant 2.000000e+01 : f32
    %1 = vector.broadcast %cst : f32 to vector<8x128xf32>
    %2 = arith.minimumf %0, %1 : vector<8x128xf32>
    %3 = math.exp %2 : vector<8x128xf32>
    %cst_1 = arith.constant 2.000000e+00 : f32
    %4 = vector.broadcast %cst_1 : f32 to vector<8x128xf32>
    %5 = arith.addf %3, %4 : vector<8x128xf32>
    %6 = arith.mulf %3, %5 : vector<8x128xf32>
    %7 = arith.mulf %0, %6 : vector<8x128xf32>
    %cst_2 = arith.constant 2.000000e+00 : f32
    %8 = vector.broadcast %cst_2 : f32 to vector<8x128xf32>
    %9 = arith.addf %6, %8 : vector<8x128xf32>
    %10 = arith.divf %7, %9 : vector<8x128xf32>
    %c0_3 = arith.constant 0 : index
    %c0_4 = arith.constant 0 : index
    %11 = vector.load %arg2[%c0_3, %c0_4] : memref<8x128xf32, #tpu.memory_space<vmem>>, vector<8x128xf32>
    tpu.vector_store %arg2[%c0_3, %c0_4], %10 {strides = array<i32>} : memref<8x128xf32, #tpu.memory_space<vmem>>, vector<8x128xf32>,
    return
  }
  func.func @transform_0(%arg0: i32) -> (i32, i32) {
    %c0_i32 = arith.constant 0 : i32
    %c0_i32_0 = arith.constant 0 : i32
    return %arg0, %c0_i32 : i32, i32
  }
  func.func @transform_1(%arg0: i32) -> (i32, i32) {
    %c0_i32 = arith.constant 0 : i32
    %c0_i32_0 = arith.constant 0 : i32
    return %arg0, %c0_i32 : i32, i32
  }
}

</mosaic_0001>

<bundles_post_ra>
// kernel: tpu_custom_call.1
= control target key start
LH: loop header
LB: loop body
LE: loop exit
PB: predicated region body
PF: predicated region fallthrough
CT: control target
= control target key end

     0   :  { %6 = vsyncpa [#allocation3], 0  ;;  %s536_s0 = inlined_call_operand.hbm [shape: f32[16,128], index: 0, kind: input, shape index: {}]   ;;  %s537_s1 = inlined_call_operand.hbm [shape: f32[16,128], index: 1, kind: output, shape index: {}]  }
   0x1   :  { %8 = vsyncpa [#allocation3 + $0x1], 0 }
   0x2   :  { %9 = vsyncpa [#allocation4], 0 }
   0x3   :  { %11 = vsyncpa [#allocation4 + $0x1], 0  ;;  %s395_s6 = smov 0   ;;  %s397_s7 = smov 0  }
   0x4   :  { %s399_s8 = smov 0   ;;  %s401_s9 = smov 0  }
   0x5 LB: > { %s416_s10 = sadd.s32 4294967295, %s381_s9   ;;  %s227_s11 = sadd.s32 4294967294, %s381_s9   ;;  %s381_s9 = sphi %s401_s9, %s554_s9   ;;  %s377_s8 = sphi %s399_s8, %s553_s8   ;;  %s373_s7 = sphi %s397_s7, %s552_s7   ;;  %s369_s6 = sphi %s395_s6, %s551_s6  }
   0x6   : > { %s420_s12 = sadd.s32 1, %s381_s9   ;;  %s24_s13 = sadd.s32 1, %s377_s8 }
   0x7   : > { %s21_s14 = ssub.s32 %s381_s9, %s420_s12  ;;  %p31_p0 = scmp.ne.s32.totalorder %s377_s8, %s373_s7 }
   0x8   : > { %p22_p1 = scmp.eq.s32.totalorder %s21_s14, 0  ;;  %p32_p2 = scmp.eq.s32.totalorder %s381_s9, 0 }
   0x9   : > { %p37_p3 = scmp.ne.s32.totalorder %s373_s7, %s369_s6  ;;  %p38_p4 = scmp.eq.s32.totalorder %s416_s10, 0 }
   0xa   : > { %s432_s15 = scalar_select %p22_p1, %s377_s8, %s24_s13  }
   0xb   : > { %p434_p5 = por %p32_p2, %p31_p0  ;;  %p438_p6 = por %p38_p4, %p37_p3 }
   0xc   : > { %p61_p7 = scmp.eq.s32.totalorder %s416_s10, 1  ;;  %p67_p8 = scmp.eq.s32.totalorder %s227_s11, 1 }
   0xd   : > { %s541_s17 = scalar_select %p438_p6, 1, 0 }
   0xe   : > { %p251_p10 = scmp.lt.s32.totalorder %s381_s9, 2  ;;  %p445_p11 = por %p61_p7, %p31_p0 }
   0xf   : > { %p449_p12 = por %p67_p8, %p37_p3  ;;  %s87_s20 = sand.u32 1, %s377_s8  }
  0x10   : > { %s542_s18 = scalar_select %p445_p11, 1, 0 }
  0x11   : > { %s543_s19 = scalar_select %p449_p12, 1, 0 }
  0x12   : > { %s231_s21 = sshll.u32 %s381_s9, 7  ;;  %s230_s22 = sshll.u32 %s87_s20, 3 }
  0x13   : > { %s458_s25 = scalar_lea.hbm %s536_s0, %s231_s21  ;;  %s91_s26 = scalar_lea.vmem [#allocation2], %s230_s22 }
  0x14   : > { %s98_s27 = sshll.u32 %s91_s26, 4  ;;  %p462_p13 = pnand %p251_p10, %p434_p5  ;;  %s466_s27 = int_to_ptr.vmem [resolvable:$true] %s98_s27 }
  0x15   : > { %s88_s29 = scalar_lea.sflag [#allocation3], %s87_s20  ;;  %s289_s30 = scalar_lea.hbm %s458_s25, 128 }
  0x16   : > { %p290_p2 = scmp.ne.s32.totalorder %s458_s25, %s289_s30  ;;  %p291_p3 = pneg %p462_p13 }
  0x17   : > { %s294_s4 = scalar_lea.hbm %s536_s0, 256  ;;  %p295_p5 = scmp.lt.s32.totalorder %s458_s25, %s536_s0 }
  0x18   : > { %p292_p4 = pnand %p291_p3, %p290_p2  ;;  %p296_p8 = scmp.lt.s32.totalorder %s294_s4, %s289_s30 }
  0x1a   : > { %p293_p7 = pneg %p292_p4  ;;  %p297_p10 = por %p296_p8, %p295_p5 }
  0x1c   : > { %p298_p9 = pnand %p297_p10, %p293_p7 }
  0x1e   : > { %301 = shalt.err (!%p298_p9)
}
  0x1f   : > { %s302_s13 = scalar_lea.vmem %s466_s27, 128  ;;  %s383_s14 = smov [#allocation2]  }
  0x20   : > { %p303_p0 = scmp.ne.s32.totalorder %s466_s27, %s302_s13  ;;  %s307_s16 = sshll.u32 %s383_s14, 4  ;;  %s308_s16 = int_to_ptr.vmem [resolvable:$false] %s307_s16 }
  0x21   : > { %s309_s20 = scalar_lea.vmem %s308_s16, 256  ;;  %p310_p4 = scmp.lt.s32.totalorder %s466_s27, %s308_s16 }
  0x22   : > { %p305_p1 = pnand %p303_p0, %p291_p3  ;;  %p311_p12 = scmp.lt.s32.totalorder %s309_s20, %s302_s13 }
  0x24   : > { %p306_p2 = pneg %p305_p1  ;;  %p312_p11 = por %p311_p12, %p310_p4 }
  0x26   : > { %p313_p6 = pnand %p312_p11, %p306_p2 }
  0x28   : > { %316 = shalt.err (!%p313_p6)
}
  0x29   : > { %246 = dma.hbm_to_vmem [thread:$0]  (!%p462_p13), %s458_s25, 128, %s466_s27, %s88_s29  }
  0x2a   : > { %p545_p9 = scmp.lt.s32.totalorder %s381_s9, 3  ;;  %p546_p7 = scmp.ge.s32.totalorder %s381_s9, 1 }
  0x2c   : > { %p104_p0 = pnand %p546_p7, %p545_p9 }
  0x2d   : > { %s493_s21 = sand.u32 (!%p104_p0), 1, %s373_s7   ;;  %p547_p6 = scmp.ne.s32.totalorder (!%p104_p0), %s541_s17, 0 }
  0x2e   : > { %107 = sbr.rel (%p104_p0) target bundleno = 106 (0x6a), region = 24  ;;  %s233_s22 = sshll.u32 (!%p104_p0), %s493_s21, 3 }
  0x2f   : > { %s110_s23 = scalar_lea.sflag (!%p104_p0), [#allocation3], %s493_s21  ;;  %s113_s24 = scalar_lea.vmem (!%p104_p0), [#allocation2], %s233_s22 }
  0x33   : > { %360 = dma.done.wait (%p547_p6), %s110_s23, 128  }
  0x34   : > { %362 = vsyncadd (%p547_p6), %s110_s23, 4294967168  ;;  %v132_v0 = vld [vmem:[%s113_s24] sm:$0xff]  ;;  %s131_s25 = scalar_lea.vmem [#allocation5], %s233_s22  ;;  %s236_s27 = sshll.u32 %s416_s10, 7 }
  0x35   : > { %v133_v1 = vmin.f32 %v132_v0, 20.0  ;;  %s157_s26 = sshll.u32 %s131_s25, 4  ;;  %s155_s29 = scalar_lea.hbm %s537_s1, %s236_s27  ;;  %s158_s26 = int_to_ptr.vmem [resolvable:$true] %s157_s26 }
  0x36   : > { %s144_s30 = scalar_lea.sflag [#allocation4], %s493_s21  ;;  %s317_s2 = scalar_lea.vmem %s158_s26, 128 }
  0x37   : > { %v134_v2 = vmul.f32 1.442695, %v133_v1  ;;  %p318_p11 = scmp.ne.s32.totalorder %s158_s26, %s317_s2  ;;  %p548_p12 = scmp.ne.s32.totalorder %s542_s18, 0 }
  0x38   : > { %s384_s3 = smov [#allocation5]  }
  0x39   : > { %285 = vpow2.f32 %v134_v2  ;;  %p319_p13 = pnand %p318_p11, %p548_p12  ;;  %s321_s4 = sshll.u32 %s384_s3, 4  ;;  %s322_s4 = int_to_ptr.vmem [resolvable:$false] %s321_s4 }
  0x3a   : > { %s323_s5 = scalar_lea.vmem %s322_s4, 256  ;;  %p324_p3 = scmp.lt.s32.totalorder %s158_s26, %s322_s4 }
  0x3b   : > { %p320_p1 = pneg %p319_p13  ;;  %p325_p5 = scmp.lt.s32.totalorder %s323_s5, %s317_s2 }
  0x3d   : > { %p326_p8 = por %p325_p5, %p324_p3 }
  0x3f   : > { %p327_p10 = pnand %p326_p8, %p320_p1 }
  0x46   : > { %v286_v3 = vpop.eup %285 }
  0x47   : > { %v136_v4 = vadd.f32 2.0, %v286_v3 }
  0x49   : > { %v137_v5 = vmul.f32 %v286_v3, %v136_v4 }
  0x4b   : > { %v139_v6 = vadd.f32 2.0, %v137_v5  ;;  %v138_v7 = vmul.f32 %v137_v5, %v132_v0 }
  0x4d   : > { %287 = vrcp.f32 %v139_v6 }
  0x5a   : > { %v288_v8 = vpop.eup %287 }
  0x5b   : > { %v141_v9 = vmul.f32 %v288_v8, %v138_v7 }
  0x5d   : > { %142 = vst [vmem:[%s131_s25] sm:$0xff] %v141_v9 }
  0x5e   : > { %330 = shalt.err (!%p327_p10)
}
  0x5f   : > { %s331_s10 = scalar_lea.hbm %s155_s29, 128  ;;  %s335_s14 = scalar_lea.hbm %s537_s1, 256 }
  0x60   : > { %p332_p2 = scmp.ne.s32.totalorder %s155_s29, %s331_s10  ;;  %p336_p7 = scmp.lt.s32.totalorder %s155_s29, %s537_s1 }
  0x61   : > { %p337_p0 = scmp.lt.s32.totalorder %s335_s14, %s331_s10 }
  0x62   : > { %p333_p4 = pnand %p332_p2, %p548_p12 }
  0x63   : > { %p338_p6 = por %p337_p0, %p336_p7 }
  0x64   : > { %p334_p9 = pneg %p333_p4 }
  0x66   : > { %p339_p11 = pnand %p338_p6, %p334_p9 }
  0x68   : > { %342 = shalt.err (!%p339_p11)
}
  0x69   : > { %241 = dma.vmem_to_hbm [thread:$0]  (%p548_p12), %s158_s26, 128, %s155_s29, %s144_s30  }
  0x6a PF: > { %s169_s21 = sand.u32 1, %s369_s6   ;;  %p549_p13 = scmp.ne.s32.totalorder %s543_s19, 0 }
  0x6b   : > { %p550_p1 = scmp.ge.s32.totalorder %s381_s9, 2  ;;  %s170_s22 = scalar_lea.sflag [#allocation4], %s169_s21 }
  0x6d   : > { %p248_p3 = pnand %p550_p1, %p549_p13 }
  0x6f   : > { %p249_p5 = pneg %p248_p3 }
  0x71   : > { %364 = dma.done.wait (%p249_p5), %s170_s22, 128  }
  0x72   : > { %366 = vsyncadd (%p249_p5), %s170_s22, 4294967168  ;;  %p14_p8 = scmp.ge.s32.totalorder %s420_s12, 4   ;;  %s551_s6 = smov %s373_s7 }
  0x73   : > { %s552_s7 = smov %s377_s8  ;;  %s553_s8 = smov %s432_s15 }
  0x74   : > { %s554_s9 = smov %s420_s12  ;;  %16 = sbr.rel (!%p14_p8) target bundleno = 5 (0x5), region = 69 }
  0x79   :  { %175 = vsyncpa [#allocation3], 1 }
  0x7a   :  { %177 = vsyncpa [#allocation3 + $0x1], 1 }
  0x7b   :  { %178 = vsyncpa [#allocation4], 1 }
  0x7c   :  { %180 = vsyncpa [#allocation4 + $0x1], 1 }

</bundles_post_ra>
